<compile_context>
chip_gen: v5e
topology: v5e:2x2
jax: 0.10.0
libtpu: 0.0.40
codegen_flags: <defaults>
</compile_context>

<pallas_src>
import jax
import jax.numpy as jnp
from jax import lax
from jax.experimental import pallas as pl
from jax.experimental.pallas import tpu as pltpu


# ---------------------------------------------------------------------------
# helpers
# ---------------------------------------------------------------------------
def _round_up(n, m):
    return -(-n // m) * m


def _pick_block_b(batch, max_block):
    """Rows per grid step: multiple of 8 (sublane), capped at max_block, and
    split so there are >= 2 grid steps whenever possible (feeds both v7x
    TensorCores via the 'parallel' grid axis and enables pipelining)."""
    if batch <= 8:
        return batch                        # one full block (== full dim is legal)
    bb = min(_round_up(batch, 8), max_block)
    if -(-batch // bb) < 2:
        bb = _round_up(-(-batch // 2), 8)
    return bb


# ---------------------------------------------------------------------------
# Primary path: whole MLP collapsed to  y = x @ w_fused + b_fused
# ---------------------------------------------------------------------------
def _fused_kernel(x_ref, w_ref, b_ref, o_ref):
    # x: (bb, D) f32   w: (1, D) f32   b: (1, 1) f32   o: (bb, 1) f32
    # Pure VPU multiply + lane reduction: exact f32, no MXU weight pushes and
    # no transpose of the streamed x tile -> kernel stays HBM-bandwidth bound.
    o_ref[...] = (
        jnp.sum(x_ref[...] * w_ref[...], axis=-1, keepdims=True) + b_ref[...]
    )


def fuse_params(params):
    """Collapse the 5 affine layers into one (1, D) row + (1, 1) bias.
    Exact for eval-mode forward (dropout = identity, no activations).
    Done once in the wrapper at HIGHEST f32 precision."""
    hp = lax.Precision.HIGHEST
    (w1, b1), rest = params[0], params[1:]
    w = w1
    b = b1
    for w_next, b_next in rest:
        w = jnp.dot(w, w_next, precision=hp)
        b = jnp.dot(b, w_next, precision=hp) + b_next
    return w.T, b                                           # (1, D), (1, 1)


def mlp_forward_fused(x, w_row, b_fused, *, block_b=2048):
    """x: (B, D) f32; w_row: (1, D); b_fused: (1, 1). Returns (B, 1) f32."""
    B, D = x.shape
    bb = _pick_block_b(B, block_b)
    n_blk = pl.cdiv(B, bb)

    return pl.pallas_call(
        _fused_kernel,
        out_shape=jax.ShapeDtypeStruct((B, 1), jnp.float32),
        grid=(n_blk,),
        in_specs=[
            pl.BlockSpec((bb, D), lambda i: (i, 0)),   # stream x; ragged last block OK
            pl.BlockSpec((1, D), lambda i: (0, 0)),    # grid-invariant fused row
            pl.BlockSpec((1, 1), lambda i: (0, 0)),    # fused bias
        ],
        out_specs=pl.BlockSpec((bb, 1), lambda i: (i, 0)),
        compiler_params=pltpu.CompilerParams(
            dimension_semantics=("parallel",),          # shard across 2 TCs on v7x
            vmem_limit_bytes=32 << 20,                  # double-buffered x tile fits
        ),
    )(x, w_row, b_fused)


# ---------------------------------------------------------------------------
# Layered path: keeps the wide matmuls on the MXU (bf16 ops, f32 accumulation)
# ---------------------------------------------------------------------------
def _layered_kernel(x_ref, w1_ref, b1_ref, w2_ref, b2_ref,
                    w345_ref, b345_ref, o_ref):
    x = x_ref[...].astype(jnp.bfloat16)                                    # (bb, D)
    h1 = jnp.dot(x, w1_ref[...],
                 preferred_element_type=jnp.float32) + b1_ref[...]         # (bb, 1024)
    # Dropout(0.2): identity at eval.
    h2 = jnp.dot(h1.astype(jnp.bfloat16), w2_ref[...],
                 preferred_element_type=jnp.float32) + b2_ref[...]         # (bb, 128)
    # Dropout(0.2) / Dropout(0.1): identity at eval.  Layers 3-5
    # (128->64->16->1) are pre-fused into one (1, 128) f32 row; VPU lane
    # contraction avoids a narrow N=64 MXU pass and extra bf16 casts.
    o_ref[...] = (
        jnp.sum(h2 * w345_ref[...], axis=-1, keepdims=True) + b345_ref[...]
    )                                                                      # (bb, 1)


def prepare_layered_params(params):
    """One-time prep: bf16 weights for the two wide layers + fused 3-5 tail."""
    hp = lax.Precision.HIGHEST
    (w1, b1), (w2, b2), (w3, b3), (w4, b4), (w5, b5) = params
    w345 = jnp.dot(jnp.dot(w3, w4, precision=hp), w5, precision=hp)            # (128, 1)
    b345 = jnp.dot(jnp.dot(b3, w4, precision=hp) + b4, w5, precision=hp) + b5  # (1, 1)
    bf = jnp.bfloat16
    return (w1.astype(bf), b1, w2.astype(bf), b2, w345.T, b345)  # tail row stays f32


def mlp_forward_layered(x, layered_params, *, block_b=1024):
    """x: (B, D) f32. layered_params from prepare_layered_params().
    block_b is capped at 1024 so the working set stays within the 32 MiB
    scoped VMEM budget on v7x (64 MiB physical)."""
    B, D = x.shape
    w1, b1, w2, b2, w345, b345 = layered_params
    bb = _pick_block_b(B, min(block_b, 1024))
    n_blk = pl.cdiv(B, bb)

    def const(arr):
        # Grid-invariant block: Pallas skips the re-DMA when the block index
        # is unchanged across grid steps.  (pl.Buffered(1) would reclaim the
        # second weight buffer's VMEM on v7x; not needed at this budget.)
        return pl.BlockSpec(arr.shape, lambda i: (0, 0))

    return pl.pallas_call(
        _layered_kernel,
        out_shape=jax.ShapeDtypeStruct((B, 1), jnp.float32),
        grid=(n_blk,),
        in_specs=[
            pl.BlockSpec((bb, D), lambda i: (i, 0)),   # tall M tile fills the MXU
            const(w1), const(b1), const(w2), const(b2),
            const(w345), const(b345),
        ],
        out_specs=pl.BlockSpec((bb, 1), lambda i: (i, 0)),
        compiler_params=pltpu.CompilerParams(
            dimension_semantics=("parallel",),
            vmem_limit_bytes=32 << 20,
        ),
    )(x, w1, b1, w2, b2, w345, b345)


# ---------------------------------------------------------------------------
# init / reference
# ---------------------------------------------------------------------------
def init_params(key, input_size):
    """PyTorch-shaped layers; weights stored transposed (in, out) so the kernel
    computes x @ W_t + b (== x @ W_pt.T + b).  Biases stored (1, out)."""
    dims = [(input_size, 1024), (1024, 128), (128, 64), (64, 16), (16, 1)]
    params = []
    for fan_in, fan_out in dims:
        key, kw, kb = jax.random.split(key, 3)
        bound = float(fan_in) ** -0.5
        w_t = jax.random.uniform(kw, (fan_in, fan_out), jnp.float32, -bound, bound)
        b = jax.random.uniform(kb, (1, fan_out), jnp.float32, -bound, bound)
        params.append((w_t, b))
    return params


def mlp_reference(x, params):
    hp = lax.Precision.HIGHEST
    h = x
    for w_t, b in params:
        h = jnp.dot(h, w_t, precision=hp) + b
    return h


# ---------------------------------------------------------------------------
if __name__ == "__main__":
    key = jax.random.PRNGKey(0)
    k_x, k_p = jax.random.split(key)

    input_size = 768   # CLIP ViT-L/14 embedding width used by the aesthetics head
    batch = 200        # deliberately NOT a tile multiple -> exercises the ragged
                       # last block (handled in-kernel, no wrapper-side padding)

    x = jax.random.normal(k_x, (batch, input_size), jnp.float32)
    params = init_params(k_p, input_size)
    ref = mlp_reference(x, params)

    # Primary: fully fused affine map, exact f32 VPU contraction.
    w_row, b_fused = fuse_params(params)
    out_fused = jax.block_until_ready(mlp_forward_fused(x, w_row, b_fused))
    assert out_fused.shape == (batch, 1)
    assert jnp.allclose(out_fused, ref, atol=1e-3, rtol=1e-3), "fused mismatch"

    # Layered: bf16 operands on the MXU with f32 accumulation (bf16 tolerance).
    layered = prepare_layered_params(params)
    out_layered = jax.block_until_ready(mlp_forward_layered(x, layered))
    assert out_layered.shape == (batch, 1)
    assert jnp.allclose(out_layered, ref, atol=3e-2, rtol=3e-2), "layered mismatch"

    print("KERNEL_OK")
</pallas_src>

<mosaic_0001>
module attributes {stable_mosaic.version = 11 : i64} {
  func.func @_fused_kernel(%arg0: i32, %arg1: memref<104x768xf32, #tpu.memory_space<vmem>>, %arg2: memref<1x768xf32, #tpu.memory_space<vmem>>, %arg3: memref<1x1xf32, #tpu.memory_space<vmem>>, %arg4: memref<104x1xf32, #tpu.memory_space<vmem>>) attributes {dimension_semantics = [#tpu.dimension_semantics<parallel>], iteration_bounds = array<i64: 2>, scalar_prefetch = 0 : i64, scratch_operands = 0 : i64, tpu.core_type = #tpu.core_type<tc>, window_params = [{transform_indices = @transform_0, window_bounds = array<i64: 104, 768>}, {pipeline_mode = #tpu.pipeline_mode<synchronous>, transform_indices = @transform_1, window_bounds = array<i64: 1, 768>}, {pipeline_mode = #tpu.pipeline_mode<synchronous>, transform_indices = @transform_2, window_bounds = array<i64: 1, 1>}, {transform_indices = @transform_3, window_bounds = array<i64: 104, 1>}]} {
    %c0 = arith.constant 0 : index
    %c0_0 = arith.constant 0 : index
    %0 = vector.load %arg1[%c0, %c0_0] : memref<104x768xf32, #tpu.memory_space<vmem>>, vector<104x768xf32>
    %c0_1 = arith.constant 0 : index
    %c0_2 = arith.constant 0 : index
    %1 = vector.load %arg2[%c0_1, %c0_2] : memref<1x768xf32, #tpu.memory_space<vmem>>, vector<1x768xf32>
    %2 = vector.broadcast %1 : vector<1x768xf32> to vector<104x768xf32>
    %3 = arith.mulf %0, %2 : vector<104x768xf32>
    %cst = arith.constant dense<0.000000e+00> : vector<104xf32>
    %4 = vector.multi_reduction <add>, %3, %cst [1] : vector<104x768xf32> to vector<104xf32>
    %5 = vector.shape_cast %4 : vector<104xf32> to vector<104x1xf32>
    %c0_3 = arith.constant 0 : index
    %c0_4 = arith.constant 0 : index
    %6 = vector.load %arg3[%c0_3, %c0_4] : memref<1x1xf32, #tpu.memory_space<vmem>>, vector<1x1xf32>
    %7 = vector.broadcast %6 : vector<1x1xf32> to vector<104x1xf32>
    %8 = arith.addf %5, %7 : vector<104x1xf32>
    %c0_5 = arith.constant 0 : index
    %c0_6 = arith.constant 0 : index
    %9 = vector.load %arg4[%c0_5, %c0_6] : memref<104x1xf32, #tpu.memory_space<vmem>>, vector<104x1xf32>
    tpu.vector_store %arg4[%c0_5, %c0_6], %8 {strides = array<i32>} : memref<104x1xf32, #tpu.memory_space<vmem>>, vector<104x1xf32>,
    return
  }
  func.func @transform_0(%arg0: i32) -> (i32, i32) {
    %c0_i32 = arith.constant 0 : i32
    %c0_i32_0 = arith.constant 0 : i32
    return %arg0, %c0_i32 : i32, i32
  }
  func.func @transform_1(%arg0: i32) -> (i32, i32) {
    %c0_i32 = arith.constant 0 : i32
    %c0_i32_0 = arith.constant 0 : i32
    %c0_i32_1 = arith.constant 0 : i32
    return %c0_i32, %c0_i32_0 : i32, i32
  }
  func.func @transform_2(%arg0: i32) -> (i32, i32) {
    %c0_i32 = arith.constant 0 : i32
    %c0_i32_0 = arith.constant 0 : i32
    %c0_i32_1 = arith.constant 0 : i32
    return %c0_i32, %c0_i32_0 : i32, i32
  }
  func.func @transform_3(%arg0: i32) -> (i32, i32) {
    %c0_i32 = arith.constant 0 : i32
    %c0_i32_0 = arith.constant 0 : i32
    return %arg0, %c0_i32 : i32, i32
  }
}

</mosaic_0001>

<bundles_post_ra>
// kernel: tpu_custom_call.1
= control target key start
LH: loop header
LB: loop body
LE: loop exit
PB: predicated region body
PF: predicated region fallthrough
CT: control target
= control target key end

     0   :  { %s1568_s0 = inlined_call_operand.hbm [shape: f32[200,768], index: 0, kind: input, shape index: {}]   ;;  %s1569_s1 = inlined_call_operand.hbm [shape: f32[1,768], index: 1, kind: input, shape index: {}]   ;;  %s1570_s2 = inlined_call_operand.<no memory space> [shape: f32[1,1], index: 2, kind: input, shape index: {}]   ;;  %s1571_s3 = inlined_call_operand.vmem [shape: f32[200,1], index: 3, kind: output, shape index: {}]  }
   0x1   :  { %v8_v0 = vstv %s1570_s2 }
   0x2   :  { %9 = vst [vmem:[#allocation2] sm:$0x1] %v8_v0 }
   0x3   :  { %10 = vsyncpa [#allocation4], 0 }
   0x4   :  { %12 = vsyncpa [#allocation4 + $0x1], 0 }
   0x5   :  { %13 = vsyncpa [#allocation6], 0  ;;  %s1150_s14 = smov 0   ;;  %s1152_s15 = smov 0  }
   0x6   :  { %s1154_s16 = smov 0   ;;  %s1156_s17 = smov 0  }
   0x7 LB: > { %s1169_s2 = sadd.s32 4294967295, %s1089_s17   ;;  %s1172_s18 = sadd.s32 1, %s1089_s17   ;;  %s1089_s17 = sphi %s1156_s17, %s1588_s17   ;;  %s1085_s16 = sphi %s1154_s16, %s1587_s16   ;;  %s1081_s15 = sphi %s1152_s15, %s1586_s15   ;;  %s1077_s14 = sphi %s1150_s14, %s1585_s14  }
   0x8   : > { %s23_s19 = ssub.s32 %s1089_s17, %s1172_s18  ;;  %s26_s20 = sadd.s32 1, %s1085_s16 }
   0x9   : > { %p24_p0 = scmp.eq.s32.totalorder %s23_s19, 0  ;;  %p33_p1 = scmp.ne.s32.totalorder %s1085_s16, %s1081_s15 }
   0xa   : > { %p34_p2 = scmp.eq.s32.totalorder %s1089_s17, 0  ;;  %p39_p3 = scmp.ne.s32.totalorder %s1081_s15, %s1077_s14 }
   0xb   : > { %s1182_s21 = scalar_select %p24_p0, %s1085_s16, %s26_s20  }
   0xc   : > { %p1184_p4 = por %p34_p2, %p33_p1  ;;  %p1572_p5 = scmp.eq.s32.totalorder %s1169_s2, 0 }
   0xd   : > { %p105_p6 = scmp.eq.s32.totalorder %s1169_s2, 1  ;;  %p804_p7 = scmp.ge.s32.totalorder %s1089_s17, 1 }
   0xe   : > { %p1193_p8 = por %p1572_p5, %p39_p3  ;;  %p118_p9 = scmp.lt.s32.totalorder %s1089_s17, 3 }
   0xf   : > { %p1198_p10 = por %p105_p6, %p33_p1  ;;  %s130_s28 = sshll.u32 %s1569_s1, 4  ;;  %s131_s28 = int_to_ptr.hbm [resolvable:$true] %s130_s28 }
  0x10   : > { %p1202_p11 = pnand %p804_p7, %p118_p9  ;;  %s1123_s29 = smov [#allocation5]  }
  0x11   : > { %s132_s30 = sshll.u32 %s1123_s29, 4  ;;  %p806_p0 = scmp.ge.s32.totalorder %s1089_s17, 2  ;;  %s133_s30 = int_to_ptr.vmem [resolvable:$true] %s132_s30 }
  0x12   : > { %p836_p12 = pneg %p1202_p11 }
  0x13   : > { %142 = sbr.rel (%p806_p0) target bundleno = 66 (0x42), region = 24 }
  0x14   : > { %p837_p13 = pnand %p836_p12, %p1572_p5 }
  0x16   : > { %839 = dma.hbm_to_vmem [thread:$0]  (!%p837_p13), %s131_s28, 96, %s133_s30, [#allocation6]  }
  0x18   : > { %145 = sbr.rel (!%p1184_p4) target bundleno = 66 (0x42), region = 28  ;;  %s146_s4 = sand.u32 (%p1184_p4), 1, %s1085_s16  }
  0x19   : > { %s151_s5 = smul.u32 (%p1184_p4), 13, %s1089_s17  ;;  %s1218_s11 = scalar_lea.sflag (%p1184_p4), [#allocation4], %s146_s4 }
  0x1a   : > { %s827_s6 = smul.u32 (%p1184_p4), 624, %s146_s4 }
  0x1b   : > { %s152_s7 = ssub.s32 (%p1184_p4), 25, %s151_s5 }
  0x1c   : > { %p153_p1 = scmp.lt.s32.totalorder (%p1184_p4), %s152_s7, 13  ;;  %s150_s12 = scalar_lea.vmem (%p1184_p4), [#allocation3], %s827_s6 }
  0x1e   : > { %s1590_s7 = smov (!%p153_p1, %s152_s7), 13 }
  0x1f   : > { %s808_s8 = smul.u32 48, %s1590_s7 }
  0x21   : > { %s157_s9 = ssub.s32 624, %s808_s8 }
  0x22   : > { %s158_s10 = sshll.u32 %s157_s9, 4 }
  0x23   : > { %159 = vsyncadd %s1218_s11, %s158_s10  ;;  %p1221_p2 = scmp.ne.s32.totalorder %s808_s8, 0  ;;  %s841_s14 = smul.u32 624, %s1089_s17 }
  0x24   : > { %s1226_s19 = sshll.u32 %s150_s12, 4  ;;  %s1228_s20 = smul.u32 768, %s1590_s7  ;;  %s168_s19 = int_to_ptr.vmem [resolvable:$true] %s1226_s19 }
  0x25   : > { %s163_s27 = scalar_lea.hbm %s1568_s0, %s841_s14  ;;  %s991_s8 = scalar_lea.hbm %s1568_s0, 1200 }
  0x26   : > { %s165_s28 = sshll.u32 %s163_s27, 4  ;;  %s982_s17 = sshrl.u32 %s1228_s20, 4  ;;  %s1234_s28 = int_to_ptr.hbm [resolvable:$true] %s165_s28 }
  0x27   : > { %s980_s29 = sshra.s32 %s1234_s28, 4  ;;  %s1018_s30 = sshll.u32 %s982_s17, 4  ;;  %s981_s29 = int_to_ptr.hbm [resolvable:$true] %s980_s29 }
  0x28   : > { %p984_p3 = scmp.ne.s32.totalorder %s1018_s30, %s1228_s20  ;;  %s985_s4 = sadd.s32 1, %s982_s17 }
  0x29   : > { %p992_p9 = scmp.lt.s32.totalorder %s981_s29, %s1568_s0 }
  0x2a   : > { %s1592_s4 = smov (!%p984_p3, %s985_s4), %s982_s17 }
  0x2b   : > { %s987_s5 = scalar_lea.hbm %s981_s29, %s1592_s4 }
  0x2c   : > { %p988_p4 = scmp.ne.s32.totalorder %s981_s29, %s987_s5  ;;  %p993_p12 = scmp.lt.s32.totalorder %s991_s8, %s987_s5 }
  0x2e   : > { %p989_p6 = pnand %p988_p4, %p1221_p2  ;;  %p994_p13 = por %p993_p12, %p992_p9 }
  0x30   : > { %p990_p7 = pneg %p989_p6 }
  0x32   : > { %p995_p0 = pnand %p994_p13, %p990_p7 }
  0x34   : > { %998 = shalt.err (!%p995_p0)
}
  0x35   : > { %s999_s12 = sshra.s32 %s168_s19, 4  ;;  %s1124_s22 = smov [#allocation3]   ;;  %s1000_s12 = int_to_ptr.vmem [resolvable:$true] %s999_s12 }
  0x36   : > { %s1006_s14 = scalar_lea.vmem %s1000_s12, %s1592_s4  ;;  %s1010_s26 = scalar_lea.vmem %s1124_s22, 1248 }
  0x37   : > { %p1007_p1 = scmp.ne.s32.totalorder %s1000_s12, %s1006_s14  ;;  %p1012_p6 = scmp.lt.s32.totalorder %s1010_s26, %s1006_s14 }
  0x39   : > { %p1008_p3 = pnand %p1007_p1, %p1221_p2 }
  0x3b   : > { %p1009_p4 = pneg %p1008_p3 }
  0x3d   : > { %p1014_p5 = pnand %p1012_p6, %p1009_p4 }
  0x3f   : > { %1017 = shalt.err (!%p1014_p5)
}
  0x40   : > { %s1125_s27 = smov 768   ;;  %s1126_s29 = smov 48  }
  0x41   : > { %173 = dma.hbm_to_vmem [thread:$0]  (%p1221_p2), %s1234_s28, %s1228_s20, %s168_s19, %s1218_s11, %s1125_s27, %s1125_s27, %s1126_s29  }
  0x42 PF: > { %179 = sbr.rel (%p1202_p11) target bundleno = 302 (0x12e), region = 32  ;;  %s1261_s17 = sand.u32 (!%p1202_p11), 1, %s1081_s15  }
  0x43   : > { %s829_s30 = smul.u32 (!%p1202_p11), 624, %s1261_s17  ;;  %s182_s4 = scalar_lea.sflag (!%p1202_p11), [#allocation4], %s1261_s17 }
  0x45   : > { %s1265_s5 = scalar_lea.vmem (!%p1202_p11), [#allocation3], %s829_s30 }
  0x47   : > { %1068 = dma.done.wait (%p1193_p8), %s182_s4, 9984  }
  0x48   : > { %1070 = vsyncadd (%p1193_p8), %s182_s4, 4294957312  ;;  %p1578_p5 = scmp.eq.s32.totalorder %s1169_s2, 0 }
  0x4a   : > { %1072 = dma.done.wait (%p1578_p5), [#allocation6], 96   ;;  %p1579_p11 = pmov %p1578_p5 }
  0x4b   : > { %v224_v1 = vld [vmem:[%s1265_s5] sm:$0xff]  ;;  %v225_v2 = vld [vmem:[%s1265_s5 + $0x8] sm:$0xff]  ;;  %v226_v3 = vld [vmem:[%s1265_s5 + $0x10] sm:$0xff]  ;;  %s830_s23 = smul.u32 104, %s1261_s17  ;;  %vm502_vm0 = vcmask 7168  }
  0x4c   : > { %1074 = vsyncadd (%p1579_p11), [#allocation6], 4294967200  ;;  %v227_v4 = vld [vmem:[%s1265_s5 + $0x18] sm:$0xff]  ;;  %v302_v5 = vld [vmem:[#allocation5] sm:$0x3f]  ;;  %s523_s11 = smul.u32 (%p1198_p10), 13, %s1169_s2 }
  0x4d   : > { %v1279_v6 = vperm.slane %v302_v5, 0  ;;  %v1281_v7 = vperm.slane %v302_v5, 1  ;;  %v1283_v8 = vperm.slane %v302_v5, 2  ;;  %v1285_v9 = vperm.slane %v302_v5, 3  ;;  %v248_v10 = vld [vmem:[%s1265_s5 + $0xc0] sm:$0xff]  ;;  %v249_v11 = vld [vmem:[%s1265_s5 + $0xc8] sm:$0xff] }
  0x4e   : > { %v228_v12 = vld [vmem:[%s1265_s5 + $0x20] sm:$0xff]  ;;  %v229_v13 = vld [vmem:[%s1265_s5 + $0x28] sm:$0xff]  ;;  %v1291_v14 = vperm.slane %v302_v5, 4  ;;  %v1293_v15 = vperm.slane %v302_v5, 5  ;;  %v250_v16 = vld [vmem:[%s1265_s5 + $0xd0] sm:$0xff]  ;;  %s1444_s25 = scalar_lea.vmem [#allocation7], %s830_s23  }
  0x4f   : > { %v316_v17 = vmul.f32 %v1279_v6, %v224_v1  ;;  %v317_v18 = vmul.f32 %v1281_v7, %v225_v2  ;;  %v318_v19 = vmul.f32 %v1283_v8, %v226_v3  ;;  %v251_v20 = vld [vmem:[%s1265_s5 + $0xd8] sm:$0xff]  ;;  %v236_v21 = vld [vmem:[%s1265_s5 + $0x60] sm:$0xff]  ;;  %v237_v22 = vld [vmem:[%s1265_s5 + $0x68] sm:$0xff]  ;;  %v319_v23 = vmul.f32 %v1285_v9, %v227_v4  ;;  %s826_s13 = smul.u32 (%p1198_p10), 104, %s1169_s2  ;;  %s524_s19 = ssub.s32 (%p1198_p10), 25, %s523_s11 }
  0x50   : > { %v252_v24 = vld [vmem:[%s1265_s5 + $0xe0] sm:$0xff]  ;;  %v253_v25 = vld [vmem:[%s1265_s5 + $0xe8] sm:$0xff]  ;;  %v340_v26 = vmul.f32 %v1279_v6, %v248_v10  ;;  %v341_v27 = vmul.f32 %v1281_v7, %v249_v11  ;;  %v238_v28 = vld [vmem:[%s1265_s5 + $0x70] sm:$0xff]  ;;  %v320_v29 = vmul.f32 %v1291_v14, %v228_v12  ;;  %v321_v30 = vmul.f32 %v1293_v15, %v229_v13  ;;  %p525_p8 = scmp.lt.s32.totalorder (%p1198_p10), %s524_s19, 13 }
  0x51   : > { %v394_v31 = vadd.f32 %v317_v18, %v316_v17  ;;  %v342_v32 = vmul.f32 %v1283_v8, %v250_v16  ;;  %v239_v33 = vld [vmem:[%s1265_s5 + $0x78] sm:$0xff]  ;;  %v230_v34 = vld [vmem:[%s1265_s5 + $0x30] sm:$0xff]  ;;  %v343_v35 = vmul.f32 %v1285_v9, %v251_v20  ;;  %v240_v37 = vld [vmem:[%s1265_s5 + $0x80] sm:$0xff]  ;;  %v328_v38 = vmul.f32 %v1279_v6, %v236_v21  ;;  %s1479_s6 = scalar_lea.vmem (%p1198_p10), %s1571_s3, %s826_s13  }
  0x52   : > { %v422_v36 = vadd.f32 %v341_v27, %v340_v26  ;;  %v329_v39 = vmul.f32 %v1281_v7, %v237_v22  ;;  %v231_v40 = vld [vmem:[%s1265_s5 + $0x38] sm:$0xff]  ;;  %v232_v41 = vld [vmem:[%s1265_s5 + $0x40] sm:$0xff]  ;;  %v344_v43 = vmul.f32 %v1291_v14, %v252_v24  ;;  %v345_v44 = vmul.f32 %v1293_v15, %v253_v25  ;;  %v241_v45 = vld [vmem:[%s1265_s5 + $0x88] sm:$0xff] }
  0x53   : > { %v395_v42 = vadd.f32 %v394_v31, %v318_v19  ;;  %v330_v46 = vmul.f32 %v1283_v8, %v238_v28  ;;  %v233_v47 = vld [vmem:[%s1265_s5 + $0x48] sm:$0xff]  ;;  %v331_v49 = vmul.f32 %v1285_v9, %v239_v33  ;;  %v322_v51 = vmul.f32 %v1279_v6, %v230_v34  ;;  %v254_v52 = vld [vmem:[%s1265_s5 + $0xf0] sm:$0xff]  ;;  %v255_v53 = vld [vmem:[%s1265_s5 + $0xf8] sm:$0xff] }
  0x54   : > { %v423_v48 = vadd.f32 %v422_v36, %v342_v32  ;;  %v408_v50 = vadd.f32 %v329_v39, %v328_v38  ;;  %v332_v55 = vmul.f32 %v1291_v14, %v240_v37  ;;  %v234_v56 = vld [vmem:[%s1265_s5 + $0x50] sm:$0xff]  ;;  %v323_v57 = vmul.f32 %v1281_v7, %v231_v40  ;;  %v256_v59 = vld [vmem:[%s1265_s5 + $0x100] sm:$0xff]  ;;  %v235_v63 = vld [vmem:[%s1265_s5 + $0x58] sm:$0xff] }
  0x55   : > { %v396_v54 = vadd.f32 %v395_v42, %v319_v23  ;;  %v324_v58 = vmul.f32 %v1283_v8, %v232_v41  ;;  %v333_v61 = vmul.f32 %v1293_v15, %v241_v45  ;;  %v325_v0 = vmul.f32 %v1285_v9, %v233_v47  ;;  %v257_v1 = vld [vmem:[%s1265_s5 + $0x108] sm:$0xff]  ;;  %v242_v10 = vld [vmem:[%s1265_s5 + $0x90] sm:$0xff]  ;;  %v243_v18 = vld [vmem:[%s1265_s5 + $0x98] sm:$0xff] }
  0x56   : > { %v424_v60 = vadd.f32 %v423_v48, %v343_v35  ;;  %v409_v62 = vadd.f32 %v408_v50, %v330_v46  ;;  %v401_v3 = vadd.f32 %v323_v57, %v322_v51  ;;  %v346_v4 = vmul.f32 %v1279_v6, %v254_v52  ;;  %v258_v16 = vld [vmem:[%s1265_s5 + $0x110] sm:$0xff]  ;;  %v244_v19 = vld [vmem:[%s1265_s5 + $0xa0] sm:$0xff]  ;;  %v259_v23 = vld [vmem:[%s1265_s5 + $0x118] sm:$0xff] }
  0x57   : > { %v397_v2 = vadd.f32 %v396_v54, %v320_v29  ;;  %v347_v5 = vmul.f32 %v1281_v7, %v255_v53  ;;  %v326_v13 = vmul.f32 %v1291_v14, %v234_v56  ;;  %v348_v17 = vmul.f32 %v1283_v8, %v256_v59  ;;  %v245_v25 = vld [vmem:[%s1265_s5 + $0xa8] sm:$0xff]  ;;  %v260_v31 = vld [vmem:[%s1265_s5 + $0x120] sm:$0xff]  ;;  %v246_v34 = vld [vmem:[%s1265_s5 + $0xb0] sm:$0xff] }
  0x58   : > { %v425_v11 = vadd.f32 %v424_v60, %v344_v43  ;;  %v410_v12 = vadd.f32 %v409_v62, %v331_v49  ;;  %v327_v21 = vmul.f32 %v1293_v15, %v235_v63  ;;  %v402_v22 = vadd.f32 %v401_v3, %v324_v58  ;;  %v261_v32 = vld [vmem:[%s1265_s5 + $0x128] sm:$0xff]  ;;  %v247_v35 = vld [vmem:[%s1265_s5 + $0xb8] sm:$0xff]  ;;  %v262_v38 = vld [vmem:[%s1265_s5 + $0x130] sm:$0xff] }
  0x59   : > { %v398_v20 = vadd.f32 %v397_v2, %v321_v30  ;;  %v349_v24 = vmul.f32 %v1285_v9, %v257_v1  ;;  %v429_v28 = vadd.f32 %v347_v5, %v346_v4  ;;  %v334_v29 = vmul.f32 %v1279_v6, %v242_v10  ;;  %v263_v43 = vld [vmem:[%s1265_s5 + $0x138] sm:$0xff]  ;;  %v272_v48 = vld [vmem:[%s1265_s5 + $0x180] sm:$0xff]  ;;  %v273_v49 = vld [vmem:[%s1265_s5 + $0x188] sm:$0xff] }
  0x5a   : > { %v426_v26 = vadd.f32 %v425_v11, %v345_v44  ;;  %v411_v27 = vadd.f32 %v410_v12, %v332_v55  ;;  %v403_v33 = vadd.f32 %v402_v22, %v325_v0  ;;  %v350_v30 = vmul.f32 %v1291_v14, %v258_v16  ;;  %v274_v50 = vld [vmem:[%s1265_s5 + $0x190] sm:$0xff]  ;;  %v264_v54 = vld [vmem:[%s1265_s5 + $0x140] sm:$0xff]  ;;  %v265_v55 = vld [vmem:[%s1265_s5 + $0x148] sm:$0xff] }
  0x5b   : > { %399 = vadd.xlane.f32.xlu0 %v398_v20  ;;  %v335_v36 = vmul.f32 %v1281_v7, %v243_v18  ;;  %v336_v37 = vmul.f32 %v1283_v8, %v244_v19  ;;  %v351_v40 = vmul.f32 %v1293_v15, %v259_v23  ;;  %v430_v41 = vadd.f32 %v429_v28, %v348_v17  ;;  %v266_v62 = vld [vmem:[%s1265_s5 + $0x150] sm:$0xff]  ;;  %v267_v3 = vld [vmem:[%s1265_s5 + $0x158] sm:$0xff]  ;;  %v268_v4 = vld [vmem:[%s1265_s5 + $0x160] sm:$0xff] }
  0x5c   : > { %427 = vadd.xlane.f32.xlu2 %v426_v26  ;;  %v412_v39 = vadd.f32 %v411_v27, %v333_v61  ;;  %v337_v42 = vmul.f32 %v1285_v9, %v245_v25  ;;  %v404_v44 = vadd.f32 %v403_v33, %v326_v13  ;;  %v352_v46 = vmul.f32 %v1279_v6, %v260_v31  ;;  %v275_v61 = vld [vmem:[%s1265_s5 + $0x198] sm:$0xff]  ;;  %v276_v13 = vld [vmem:[%s1265_s5 + $0x1a0] sm:$0xff]  ;;  %v277_v16 = vld [vmem:[%s1265_s5 + $0x1a8] sm:$0xff] }
  0x5d   : > { %v415_v45 = vadd.f32 %v335_v36, %v334_v29  ;;  %v353_v47 = vmul.f32 %v1281_v7, %v261_v32  ;;  %v431_v51 = vadd.f32 %v430_v41, %v349_v24  ;;  %v338_v52 = vmul.f32 %v1291_v14, %v246_v34  ;;  %v269_v17 = vld [vmem:[%s1265_s5 + $0x168] sm:$0xff]  ;;  %v278_v22 = vld [vmem:[%s1265_s5 + $0x1b0] sm:$0xff]  ;;  %v279_v28 = vld [vmem:[%s1265_s5 + $0x1b8] sm:$0xff] }
  0x5e   : > { %413 = vadd.xlane.f32.xlu1 %v412_v39  ;;  %v339_v53 = vmul.f32 %v1293_v15, %v247_v35  ;;  %v354_v56 = vmul.f32 %v1283_v8, %v262_v38  ;;  %v405_v57 = vadd.f32 %v404_v44, %v327_v21  ;;  %v355_v59 = vmul.f32 %v1285_v9, %v263_v43  ;;  %v270_v25 = vld [vmem:[%s1265_s5 + $0x170] sm:$0xff]  ;;  %v280_v29 = vld [vmem:[%s1265_s5 + $0x1c0] sm:$0xff]  ;;  %v281_v35 = vld [vmem:[%s1265_s5 + $0x1c8] sm:$0xff] }
  0x5f   : > { %v416_v58 = vadd.f32 %v415_v45, %v336_v37  ;;  %v436_v60 = vadd.f32 %v353_v47, %v352_v46  ;;  %v432_v63 = vadd.f32 %v431_v51, %v350_v30  ;;  %v364_v0 = vmul.f32 %v1279_v6, %v272_v48  ;;  %v271_v30 = vld [vmem:[%s1265_s5 + $0x178] sm:$0xff]  ;;  %v282_v44 = vld [vmem:[%s1265_s5 + $0x1d0] sm:$0xff]  ;;  %v292_v48 = vld [vmem:[%s1265_s5 + $0x220] sm:$0xff] }
  0x60   : > { %v365_v1 = vmul.f32 %v1281_v7, %v273_v49  ;;  %v366_v2 = vmul.f32 %v1283_v8, %v274_v50  ;;  %v356_v10 = vmul.f32 %v1291_v14, %v264_v54  ;;  %v357_v11 = vmul.f32 %v1293_v15, %v265_v55  ;;  %v291_v41 = vld [vmem:[%s1265_s5 + $0x218] sm:$0xff] }
  0x61   : > { %v417_v5 = vadd.f32 %v416_v58, %v337_v42  ;;  %v437_v12 = vadd.f32 %v436_v60, %v354_v56  ;;  %v433_v18 = vadd.f32 %v432_v63, %v351_v40  ;;  %v367_v19 = vmul.f32 %v1285_v9, %v275_v61  ;;  %v290_v40 = vld [vmem:[%s1265_s5 + $0x210] sm:$0xff]  ;;  %v283_v45 = vld [vmem:[%s1265_s5 + $0x1d8] sm:$0xff]  ;;  %v284_v58 = vld [vmem:[%s1265_s5 + $0x1e0] sm:$0xff] }
  0x62   : > { %v450_v20 = vadd.f32 %v365_v1, %v364_v0  ;;  %v358_v21 = vmul.f32 %v1279_v6, %v266_v62  ;;  %v359_v26 = vmul.f32 %v1281_v7, %v267_v3  ;;  %v360_v27 = vmul.f32 %v1283_v8, %v268_v4  ;;  %v286_v60 = vld [vmem:[%s1265_s5 + $0x1f0] sm:$0xff]  ;;  %v295_v1 = vld [vmem:[%s1265_s5 + $0x238] sm:$0xff] }
  0x63   : > { %406 = vadd.xlane.f32.xlu0 %v405_v57  ;;  %v418_v23 = vadd.f32 %v417_v5, %v338_v52  ;;  %v438_v24 = vadd.f32 %v437_v12, %v355_v59  ;;  %v368_v31 = vmul.f32 %v1291_v14, %v276_v13  ;;  %v369_v32 = vmul.f32 %v1293_v15, %v277_v16  ;;  %v285_v59 = vld [vmem:[%s1265_s5 + $0x1e8] sm:$0xff]  ;;  %v294_v0 = vld [vmem:[%s1265_s5 + $0x230] sm:$0xff]  ;;  %v296_v12 = vld [vmem:[%s1265_s5 + $0x240] sm:$0xff] }
  0x64   : > { %434 = vadd.xlane.f32.xlu2 %v433_v18  ;;  %v451_v33 = vadd.f32 %v450_v20, %v366_v2  ;;  %v361_v34 = vmul.f32 %v1285_v9, %v269_v17  ;;  %v443_v38 = vadd.f32 %v359_v26, %v358_v21  ;;  %v370_v39 = vmul.f32 %v1279_v6, %v278_v22  ;;  %v298_v20 = vld [vmem:[%s1265_s5 + $0x250] sm:$0xff] }
  0x65   : > { %v419_v36 = vadd.f32 %v418_v23, %v339_v53  ;;  %v439_v37 = vadd.f32 %v438_v24, %v356_v10  ;;  %v362_v43 = vmul.f32 %v1291_v14, %v270_v25  ;;  %v371_v46 = vmul.f32 %v1281_v7, %v279_v28  ;;  %v293_v53 = vld [vmem:[%s1265_s5 + $0x228] sm:$0xff]  ;;  %v288_v25 = vld [vmem:[%s1265_s5 + $0x200] sm:$0xff] }
  0x66   : > { %v452_v42 = vadd.f32 %v451_v33, %v367_v19  ;;  %v372_v47 = vmul.f32 %v1283_v8, %v280_v29  ;;  %v363_v50 = vmul.f32 %v1293_v15, %v271_v30  ;;  %v444_v51 = vadd.f32 %v443_v38, %v360_v27  ;;  %v297_v19 = vld [vmem:[%s1265_s5 + $0x248] sm:$0xff]  ;;  %v299_v29 = vld [vmem:[%s1265_s5 + $0x258] sm:$0xff]  ;;  %v300_v38 = vld [vmem:[%s1265_s5 + $0x260] sm:$0xff] }
  0x67   : > { %420 = vadd.xlane.f32.xlu1 %v419_v36  ;;  %v440_v49 = vadd.f32 %v439_v37, %v357_v11  ;;  %v373_v52 = vmul.f32 %v1285_v9, %v281_v35  ;;  %v457_v55 = vadd.f32 %v371_v46, %v370_v39  ;;  %v382_v56 = vmul.f32 %v1279_v6, %v290_v40  ;;  %v287_v11 = vld [vmem:[%s1265_s5 + $0x1f8] sm:$0xff]  ;;  %v289_v30 = vld [vmem:[%s1265_s5 + $0x208] sm:$0xff] }
  0x68   : > { %v453_v54 = vadd.f32 %v452_v42, %v368_v31  ;;  %v383_v57 = vmul.f32 %v1281_v7, %v291_v41  ;;  %v445_v61 = vadd.f32 %v444_v51, %v361_v34  ;;  %v374_v62 = vmul.f32 %v1291_v14, %v282_v44  ;;  %v301_v44 = vld [vmem:[%s1265_s5 + $0x268] sm:$0xff] }
  0x69   : > { %v375_v63 = vmul.f32 %v1293_v15, %v283_v45  ;;  %v384_v2 = vmul.f32 %v1283_v8, %v292_v48  ;;  %v458_v4 = vadd.f32 %v457_v55, %v372_v47  ;;  %v385_v5 = vmul.f32 %v1285_v9, %v293_v53  ;;  %v943_v51 = vld [vmem:[#allocation2] ss:$0 sm:$0xff] }
  0x6a   : > { %v454_v3 = vadd.f32 %v453_v54, %v369_v32  ;;  %v471_v10 = vadd.f32 %v383_v57, %v382_v56  ;;  %v446_v13 = vadd.f32 %v445_v61, %v362_v43  ;;  %v376_v16 = vmul.f32 %v1279_v6, %v284_v58 }
  0x6b   : > { %441 = vadd.xlane.f32.xlu0 %v440_v49  ;;  %v377_v17 = vmul.f32 %v1281_v7, %v285_v59  ;;  %v378_v18 = vmul.f32 %v1283_v8, %v286_v60  ;;  %v459_v21 = vadd.f32 %v458_v4, %v373_v52  ;;  %v386_v22 = vmul.f32 %v1291_v14, %v294_v0 }
  0x6c   : > { %455 = vadd.xlane.f32.xlu2 %v454_v3  ;;  %v387_v23 = vmul.f32 %v1293_v15, %v295_v1  ;;  %v472_v24 = vadd.f32 %v471_v10, %v384_v2  ;;  %v447_v26 = vadd.f32 %v446_v13, %v363_v50  ;;  %v379_v27 = vmul.f32 %v1285_v9, %v287_v11 }
  0x6d   : > { %v464_v28 = vadd.f32 %v377_v17, %v376_v16  ;;  %v388_v31 = vmul.f32 %v1279_v6, %v296_v12  ;;  %v460_v32 = vadd.f32 %v459_v21, %v374_v62  ;;  %v389_v34 = vmul.f32 %v1281_v7, %v297_v19 }
  0x6e   : > { %v473_v33 = vadd.f32 %v472_v24, %v385_v5  ;;  %v390_v35 = vmul.f32 %v1283_v8, %v298_v20  ;;  %v380_v36 = vmul.f32 %v1291_v14, %v288_v25  ;;  %v391_v41 = vmul.f32 %v1285_v9, %v299_v29 }
  0x6f   : > { %448 = vadd.xlane.f32.xlu1 %v447_v26  ;;  %v465_v37 = vadd.f32 %v464_v28, %v378_v18  ;;  %v461_v39 = vadd.f32 %v460_v32, %v375_v63  ;;  %v478_v42 = vadd.f32 %v389_v34, %v388_v31  ;;  %v381_v6 = vmul.f32 %v1293_v15, %v289_v30 }
  0x70   : > { %v474_v40 = vadd.f32 %v473_v33, %v386_v22  ;;  %v392_v7 = vmul.f32 %v1291_v14, %v300_v38  ;;  %v393_v47 = vmul.f32 %v1293_v15, %v301_v44 }
  0x71   : > { %v466_v43 = vadd.f32 %v465_v37, %v379_v27  ;;  %v479_v46 = vadd.f32 %v478_v42, %v390_v35 }
  0x72   : > { %v475_v45 = vadd.f32 %v474_v40, %v387_v23 }
  0x73   : > { %462 = vadd.xlane.f32.xlu0 %v461_v39  ;;  %v467_v8 = vadd.f32 %v466_v43, %v380_v36  ;;  %v480_v48 = vadd.f32 %v479_v46, %v391_v41 }
  0x74   : > { %476 = vadd.xlane.f32.xlu2 %v475_v45 }
  0x75   : > { %v468_v49 = vadd.f32 %v467_v8, %v381_v6  ;;  %v481_v50 = vadd.f32 %v480_v48, %v392_v7 }
  0x77   : > { %469 = vadd.xlane.f32.xlu1 %v468_v49  ;;  %v482_v9 = vadd.f32 %v481_v50, %v393_v47 }
  0x7b   : > { %483 = vadd.xlane.f32.xlu0 %v482_v9 }
  0xce   : > { %v400_v52 = vpop.xlane.xlu0 %399 }
  0xcf   : > { %v489_v53 = vadd.f32 %v943_v51, %v400_v52  ;;  %v428_v54 = vpop.xlane.xlu2 %427 }
  0xd0   : > { %v493_v55 = vadd.f32 %v943_v51, %v428_v54 }
  0xd1   : > { %503 = vst.msk [vmem:[%s1444_s25] sm:$0xff] %vm502_vm0, %v489_v53  ;;  %v414_v14 = vpop.xlane.xlu1 %413 }
  0xd2   : > { %507 = vst.msk [vmem:[%s1444_s25 + $0x20] sm:$0xff] %vm502_vm0, %v493_v55  ;;  %v491_v15 = vadd.f32 %v943_v51, %v414_v14 }
  0xd4   : > { %505 = vst.msk [vmem:[%s1444_s25 + $0x10] sm:$0xff] %vm502_vm0, %v491_v15 }
  0xd6   : > { %v407_v56 = vpop.xlane.xlu0 %406 }
  0xd7   : > { %v490_v57 = vadd.f32 %v943_v51, %v407_v56  ;;  %v435_v58 = vpop.xlane.xlu2 %434 }
  0xd8   : > { %v494_v59 = vadd.f32 %v943_v51, %v435_v58 }
  0xd9   : > { %504 = vst.msk [vmem:[%s1444_s25 + $0x8] sm:$0xff] %vm502_vm0, %v490_v57 }
  0xda   : > { %508 = vst.msk [vmem:[%s1444_s25 + $0x28] sm:$0xff] %vm502_vm0, %v494_v59  ;;  %v421_v60 = vpop.xlane.xlu1 %420 }
  0xdb   : > { %v492_v61 = vadd.f32 %v943_v51, %v421_v60 }
  0xdd   : > { %506 = vst.msk [vmem:[%s1444_s25 + $0x18] sm:$0xff] %vm502_vm0, %v492_v61 }
  0xde   : > { %v442_v62 = vpop.xlane.xlu0 %441 }
  0xdf   : > { %v495_v63 = vadd.f32 %v943_v51, %v442_v62  ;;  %v456_v0 = vpop.xlane.xlu2 %455 }
  0xe0   : > { %v497_v1 = vadd.f32 %v943_v51, %v456_v0 }
  0xe1   : > { %509 = vst.msk [vmem:[%s1444_s25 + $0x30] sm:$0xff] %vm502_vm0, %v495_v63 }
  0xe2   : > { %511 = vst.msk [vmem:[%s1444_s25 + $0x40] sm:$0xff] %vm502_vm0, %v497_v1  ;;  %v449_v2 = vpop.xlane.xlu1 %448 }
  0xe3   : > { %v496_v3 = vadd.f32 %v943_v51, %v449_v2 }
  0xe5   : > { %510 = vst.msk [vmem:[%s1444_s25 + $0x38] sm:$0xff] %vm502_vm0, %v496_v3 }
  0xe6   : > { %v463_v4 = vpop.xlane.xlu0 %462 }
  0xe7   : > { %v498_v5 = vadd.f32 %v943_v51, %v463_v4  ;;  %v477_v10 = vpop.xlane.xlu2 %476 }
  0xe8   : > { %v500_v11 = vadd.f32 %v943_v51, %v477_v10 }
  0xe9   : > { %512 = vst.msk [vmem:[%s1444_s25 + $0x48] sm:$0xff] %vm502_vm0, %v498_v5 }
  0xea   : > { %514 = vst.msk [vmem:[%s1444_s25 + $0x58] sm:$0xff] %vm502_vm0, %v500_v11  ;;  %v470_v12 = vpop.xlane.xlu1 %469 }
  0xeb   : > { %v499_v13 = vadd.f32 %v943_v51, %v470_v12 }
  0xed   : > { %513 = vst.msk [vmem:[%s1444_s25 + $0x50] sm:$0xff] %vm502_vm0, %v499_v13  ;;  %522 = sbr.rel (!%p1198_p10) target bundleno = 302 (0x12e), region = 44 }
  0xee   : > { %v484_v16 = vpop.xlane.xlu0 %483 }
  0xef   : > { %v501_v17 = vadd.f32 %v943_v51, %v484_v16 }
  0xf1   : > { %515 = vst.msk [vmem:[%s1444_s25 + $0x60] sm:$0xff] %vm502_vm0, %v501_v17 }
  0xf2   : > { %s1594_s19 = smov (!%p525_p8, %s524_s19), 13 }
  0xf3   : > { %s814_s7 = sshll.u32 %s1594_s19, 3 }
  0xf4   : > { %p817_p2 = scmp.eq.s32.totalorder %s814_s7, 0 }
  0xf5   : > { %944 = sdivrem.u32 (!%p817_p2), %s1594_s19, 13 }
  0xf6   : > { %533 = sbr.rel (%p817_p2) target bundleno = 302 (0x12e), region = 48 }
  0xfe   : > { %s1485_s24 = spop.drf %944 }
  0xff   : > { %s946_s8 = spop.drf %944  ;;  %p818_p10 = scmp.le.s32.totalorder %s1485_s24, 0 }
 0x100   : > { %s1580_s2 = smov (!%p818_p10), %s1479_s6  ;;  %s1581_s9 = smov (!%p818_p10), %s1444_s25 }
 0x101   : > { %747 = sbr.rel (%p818_p10) target bundleno = 276 (0x114), region = 130  ;;  %s1494_s10 = smov (!%p818_p10), 0  }
 0x102   : > { %s1496_s12 = smov (!%p818_p10), 0  }
 0x106 LB: >> { %v622_v18 = vld [vmem:[%s1097_s9] sm:$0xff]  ;;  %v624_v19 = vld [vmem:[%s1097_s9 + $0x8] sm:$0xff]  ;;  %v626_v20 = vld [vmem:[%s1097_s9 + $0x10] sm:$0xff]  ;;  %s648_s14 = sadd.s32 1, %s1101_s10  ;;  %s616_s12 = sadd.s32 1, %s1105_s12   ;;  %s1105_s12 = sphi %s1496_s12, %s616_s12   ;;  %s1101_s10 = sphi %s1494_s10, %s1584_s10   ;;  %s1097_s9 = sphi %s1581_s9, %s1583_s9   ;;  %s1093_s2 = sphi %s1580_s2, %s1582_s2  }
 0x107   : >> { %623 = vst [vmem:[%s1093_s2] sm:$0xff] %v622_v18  ;;  %v628_v21 = vld [vmem:[%s1097_s9 + $0x18] sm:$0xff]  ;;  %p649_p7 = scmp.ge.s32.totalorder %s648_s14, %s1485_s24  ;;  %v630_v22 = vld [vmem:[%s1097_s9 + $0x20] sm:$0xff]  ;;  %v632_v23 = vld [vmem:[%s1097_s9 + $0x28] sm:$0xff]  ;;  %p615_p9 = scmp.ge.s32.totalorder %s616_s12, %s1485_s24 }
 0x108   : >> { %625 = vst [vmem:[%s1093_s2 + $0x8] sm:$0xff] %v624_v19  ;;  %v634_v24 = vld [vmem:[%s1097_s9 + $0x30] sm:$0xff]  ;;  %v636_v25 = vld [vmem:[%s1097_s9 + $0x38] sm:$0xff]  ;;  %v638_v26 = vld [vmem:[%s1097_s9 + $0x40] sm:$0xff] }
 0x109   : >> { %627 = vst [vmem:[%s1093_s2 + $0x10] sm:$0xff] %v626_v20  ;;  %s1596_s14 = smov (%p649_p7, %s648_s14), 0  ;;  %v640_v27 = vld [vmem:[%s1097_s9 + $0x48] sm:$0xff]  ;;  %v642_v28 = vld [vmem:[%s1097_s9 + $0x50] sm:$0xff]  ;;  %v644_v29 = vld [vmem:[%s1097_s9 + $0x58] sm:$0xff] }
 0x10a   : >> { %629 = vst [vmem:[%s1093_s2 + $0x18] sm:$0xff] %v628_v21  ;;  %s651_s22 = smul.u32 104, %s1596_s14  ;;  %v646_v31 = vld [vmem:[%s1097_s9 + $0x60] sm:$0xff]  ;;  %s1584_s10 = smov %s1596_s14 }
 0x10b   : >> { %631 = vst [vmem:[%s1093_s2 + $0x20] sm:$0xff] %v630_v22 }
 0x10c   : >> { %633 = vst [vmem:[%s1093_s2 + $0x28] sm:$0xff] %v632_v23  ;;  %s653_s26 = scalar_lea.vmem %s1444_s25, %s651_s22 [#allocation7]   ;;  %s654_s27 = scalar_lea.vmem %s1479_s6, %s651_s22  }
 0x10d   : >> { %635 = vst [vmem:[%s1093_s2 + $0x30] sm:$0xff] %v634_v24  ;;  %s1583_s9 = smov %s653_s26 }
 0x10e   : >> { %637 = vst [vmem:[%s1093_s2 + $0x38] sm:$0xff] %v636_v25 }
 0x10f   : >> { %639 = vst [vmem:[%s1093_s2 + $0x40] sm:$0xff] %v638_v26  ;;  %618 = sbr.rel (!%p615_p9) target bundleno = 262 (0x106), region = 136 }
 0x110   : >> { %641 = vst [vmem:[%s1093_s2 + $0x48] sm:$0xff] %v640_v27 }
 0x111   : >> { %643 = vst [vmem:[%s1093_s2 + $0x50] sm:$0xff] %v642_v28 }
 0x112   : >> { %645 = vst [vmem:[%s1093_s2 + $0x58] sm:$0xff] %v644_v29 }
 0x113   : >> { %647 = vst [vmem:[%s1093_s2 + $0x60] sm:$0xff] %v646_v31  ;;  %s1582_s2 = smov %s654_s27 }
 0x114 PF: > { %947 = sdivrem.u32 %s1594_s19, 13 }
 0x115   : > { %s819_s29 = smul.u32 104, %s1485_s24 }
 0x117   : > { %s1550_s17 = scalar_lea.vmem %s1444_s25, %s819_s29 [#allocation7]   ;;  %s661_s30 = scalar_lea.vmem %s1479_s6, %s819_s29  }
 0x11d   : > { %s948_s4 = spop.drf %947 }
 0x11e   : > { %s949_s5 = spop.drf %947 }
 0x11f   : > { %p821_p12 = scmp.le.s32.totalorder %s949_s5, 0 }
 0x120   : > { %s1107_s23 = smov (!%p821_p12), %s661_s30   ;;  %s1111_s11 = smov (!%p821_p12), %s1550_s17  }
 0x121   : > { %761 = sbr.rel (%p821_p12) target bundleno = 302 (0x12e), region = 141  ;;  %s1115_s13 = smov (!%p821_p12), 0  }
 0x122   : > { %s1119_s20 = smov (!%p821_p12), 0  }
 0x126 LB: >> { %v671_v32 = vld [vmem:[%s1113_s11] sm:$0xff]  ;;  %s673_s25 = sadd.s32 1, %s1117_s13  ;;  %s665_s20 = sadd.s32 1, %s1121_s20   ;;  %s1121_s20 = sphi %s1119_s20, %s665_s20   ;;  %s1117_s13 = sphi %s1115_s13, %s1116_s13   ;;  %s1113_s11 = sphi %s1111_s11, %s678_s11   ;;  %s1109_s23 = sphi %s1107_s23, %s679_s23  }
 0x127   : >> { %672 = vst [vmem:[%s1109_s23] sm:$0xff] %v671_v32  ;;  %p674_p13 = scmp.ge.s32.totalorder %s673_s25, %s949_s5  ;;  %p664_p0 = scmp.ge.s32.totalorder %s665_s20, %s949_s5 }
 0x129   : >> { %s1598_s25 = smov (%p674_p13, %s673_s25), 0  ;;  %667 = sbr.rel (!%p664_p0) target bundleno = 294 (0x126), region = 147 }
 0x12a   : >> { %s822_s19 = sshll.u32 %s1598_s25, 3  ;;  %s1116_s13 = smov %s1598_s25  }
 0x12b   : >> { %s678_s11 = scalar_lea.vmem %s1550_s17, %s822_s19 [#allocation7]   ;;  %s679_s23 = scalar_lea.vmem %s661_s30, %s822_s19  }
 0x12e PF: > { %p16_p1 = scmp.ge.s32.totalorder %s1172_s18, 4   ;;  %s1585_s14 = smov %s1081_s15 }
 0x12f   : > { %s1586_s15 = smov %s1085_s16  ;;  %s1587_s16 = smov %s1182_s21 }
 0x130   : > { %s1588_s17 = smov %s1172_s18  ;;  %18 = sbr.rel (!%p16_p1) target bundleno = 7 (0x7), region = 158 }
 0x135   :  { %695 = vsyncpa [#allocation4], 1 }
 0x136   :  { %697 = vsyncpa [#allocation4 + $0x1], 1 }
 0x137   :  { %698 = vsyncpa [#allocation6], 1 }

</bundles_post_ra>
